<compile_context>
chip_gen: v7x
topology: tpu7x:2x2x1
jax: 0.10.0
libtpu: 0.0.40
codegen_flags: <defaults>
</compile_context>

<pallas_src>
from functools import partial

import jax
import jax.numpy as jnp
from jax.experimental import pallas as pl
from jax.experimental.pallas import tpu as pltpu


def make_positional_encoding(d_model: int, max_len: int = 500) -> jnp.ndarray:
    """Deterministically build the pe buffer, shape (max_len, 1, d_model)."""
    assert d_model % 2 == 0, "d_model must be even (as the PyTorch module assumes)"
    position = jnp.arange(0, max_len, dtype=jnp.float32)[:, None]            # (max_len, 1)
    div_term = jnp.exp(
        jnp.arange(0, d_model, 2, dtype=jnp.float32)
        * (-jnp.log(jnp.float32(10000.0)) / d_model)
    )                                                                         # (d_model/2,)
    angles = position * div_term                                              # (max_len, d_model/2)
    pe = jnp.zeros((max_len, d_model), dtype=jnp.float32)
    pe = pe.at[:, 0::2].set(jnp.sin(angles))
    pe = pe.at[:, 1::2].set(jnp.cos(angles))
    return pe[:, None, :]                                                     # (max_len, 1, d_model)


def _pe_add_kernel(x_ref, pe_ref, o_ref, *, n_slabs: int, d_model: int,
                   max_unroll: int = 64):
    # x_ref/o_ref: (tS, n_slabs*D)   pe_ref: (tS, D)
    pe = pe_ref[...]
    if n_slabs == 1:
        o_ref[...] = (x_ref[...] + pe).astype(o_ref.dtype)
    elif n_slabs <= max_unroll:
        # Per-batch slab adds on static ref views (zero-cost slicing); no
        # (tS, n_slabs*D) pe intermediate is ever materialized.
        for b in range(n_slabs):
            lo = b * d_model
            o_ref[:, lo:lo + d_model] = (
                x_ref[:, lo:lo + d_model] + pe
            ).astype(o_ref.dtype)
    else:
        # Rare fallback (huge batch with no 128-dense lane split available):
        # materialize the broadcast once per tile.
        t_s = pe.shape[0]
        pe_b = jnp.broadcast_to(pe[:, None, :], (t_s, n_slabs, d_model))
        pe_b = pe_b.reshape(t_s, n_slabs * d_model)
        o_ref[...] = (x_ref[...] + pe_b).astype(o_ref.dtype)


def _default_tile_bytes() -> int:
    """Generation-aware x-tile size target."""
    try:
        kind = jax.devices()[0].device_kind.lower()
    except Exception:
        return 4 << 20
    if ("v7" in kind) or ("7x" in kind):
        return 6 << 20      # 3.2 TB/s: amortize ~0.35 us/step pipeline overhead
    if "v6" in kind:
        return 4 << 20      # fits v6e's 32 MiB scoped default without override
    return 3 << 20          # v5e & older: per-step overhead already <10%


_MAX_UNROLL = 64  # max statically-unrolled batch slabs per tile


def positional_encoding_forward(
    x: jnp.ndarray,
    pe: jnp.ndarray,
    *,
    target_tile_bytes: int | None = None,
    donate_x: bool = False,
    use_core_parallel: bool | None = None,
) -> jnp.ndarray:
    """x: (S, B, D); pe: (max_len, 1, D). Returns x + pe[:S] (PyTorch promotion)."""
    S, B, D = x.shape
    max_len = pe.shape[0]
    assert pe.shape == (max_len, 1, D)
    assert S <= max_len, "sequence length exceeds positional-encoding table"

    if target_tile_bytes is None:
        target_tile_bytes = _default_tile_bytes()

    # PyTorch `x + pe` promotion semantics (bf16 x + f32 pe -> f32 output).
    out_dtype = jnp.result_type(x.dtype, pe.dtype)

    # Free, contiguous reshapes: lane axis is B*D, sublane axis is the S tile.
    x2 = x.reshape(S, B * D)
    pe2 = pe.reshape(max_len, D)

    itemsize_x = x2.dtype.itemsize
    itemsize_o = jnp.dtype(out_dtype).itemsize
    itemsize_pe = pe2.dtype.itemsize

    # ---- lane (batch) blocking: guard wide rows / huge batches ------------
    b_blk = B
    row_bytes = B * D * itemsize_x
    if B > 1 and (row_bytes > target_tile_bytes or B > _MAX_UNROLL):
        desired = max(1, min(B,
                             target_tile_bytes // max(D * itemsize_x, 1),
                             _MAX_UNROLL))
        for cand in range(desired, 0, -1):
            if (cand * D) % 128 == 0:     # keep lane blocks 128-dense
                b_blk = cand
                break
        # If no candidate keeps blocks lane-dense, keep the full row
        # (still correct; only a perf concern for exotic shapes).

    lane_block = b_blk * D
    lane_block_bytes = lane_block * itemsize_x

    # ---- sublane (sequence) blocking ---------------------------------------
    t_s = max(1, target_tile_bytes // max(lane_block_bytes, 1))
    t_s = max(8, (t_s // 8) * 8)                    # multiple of 8 (sublane-dense)
    s_pad = pl.cdiv(S, 8) * 8
    t_s = min(t_s, s_pad)

    grid = (pl.cdiv(S, t_s), pl.cdiv(B, b_blk))

    # ---- VMEM budget (double-buffered) & compiler params -------------------
    x_tile_bytes = t_s * lane_block * itemsize_x
    o_tile_bytes = t_s * lane_block * itemsize_o
    pe_tile_bytes = t_s * D * itemsize_pe
    footprint = 2 * (x_tile_bytes + o_tile_bytes + pe_tile_bytes)
    needed = footprint * 3 // 2 + (2 << 20)
    if needed <= (16 << 20):
        vmem_limit = None                            # fits every scoped default
    else:
        vmem_limit = int(min(max(needed, 32 << 20), 48 << 20))  # < v7x 64 MiB phys

    cost = pl.CostEstimate(
        flops=S * B * D,
        transcendentals=0,
        bytes_accessed=S * B * D * (itemsize_x + itemsize_o) + S * D * itemsize_pe,
    )

    kernel = partial(_pe_add_kernel, n_slabs=b_blk, d_model=D,
                     max_unroll=_MAX_UNROLL)

    def run(semantics):
        return pl.pallas_call(
            kernel,
            out_shape=jax.ShapeDtypeStruct((S, B * D), out_dtype),
            grid_spec=pl.GridSpec(
                grid=grid,
                in_specs=[
                    pl.BlockSpec((t_s, lane_block), lambda i, j: (i, j)),  # x tile
                    pl.BlockSpec((t_s, D), lambda i, j: (i, 0)),           # pe[:S] tile
                ],
                out_specs=pl.BlockSpec((t_s, lane_block), lambda i, j: (i, j)),
            ),
            compiler_params=pltpu.CompilerParams(
                dimension_semantics=semantics,
                vmem_limit_bytes=vmem_limit,
            ),
            cost_estimate=cost,
            # Reuse x's HBM buffer only when the caller says x is dead AND the
            # output dtype matches (otherwise aliasing would be invalid).
            input_output_aliases=({0: 0} if (donate_x and out_dtype == x2.dtype) else {}),
        )(x2, pe2)

    # v7x: engage both TensorCores on the S axis; fall back cleanly otherwise.
    if use_core_parallel is None:
        try:
            kind = jax.devices()[0].device_kind.lower()
        except Exception:
            kind = ""
        use_core_parallel = ("v7" in kind) or ("7x" in kind)

    core_par = getattr(pltpu, "CORE_PARALLEL", None)
    out2 = None
    if use_core_parallel and core_par is not None and grid[0] >= 2:
        try:
            out2 = run((core_par, pltpu.PARALLEL))
        except Exception:
            out2 = None
    if out2 is None:
        out2 = run(("parallel", "parallel"))

    return out2.reshape(S, B, D)


if __name__ == "__main__":
    # Small shapes consistent with the module: seq=8, batch=2, d_model=32.
    S, B, D = 8, 2, 32
    MAX_LEN = 500

    key = jax.random.PRNGKey(0)
    x = jax.random.normal(key, (S, B, D), dtype=jnp.float32)

    pe = make_positional_encoding(D, MAX_LEN)

    out = positional_encoding_forward(x, pe)
    out = jax.block_until_ready(out)

    # Correctness check against the plain-JAX reference of the PyTorch forward.
    ref = x + pe[:S]
    assert out.shape == (S, B, D)
    assert out.dtype == ref.dtype
    assert jnp.allclose(out, ref, atol=1e-6, rtol=1e-6)

    print("KERNEL_OK")
</pallas_src>

<mosaic_0001>
module attributes {stable_mosaic.version = 11 : i64} {
  func.func @_pe_add_kernel(%arg0: i32, %arg1: i32, %arg2: memref<8x64xf32, #tpu.memory_space<vmem>>, %arg3: memref<8x32xf32, #tpu.memory_space<vmem>>, %arg4: memref<8x64xf32, #tpu.memory_space<vmem>>) attributes {dimension_semantics = [#tpu.dimension_semantics<parallel>, #tpu.dimension_semantics<parallel>], iteration_bounds = array<i64: 1, 1>, scalar_prefetch = 0 : i64, scratch_operands = 0 : i64, tpu.core_type = #tpu.core_type<tc>, window_params = [{transform_indices = @transform_0, window_bounds = array<i64: 8, 64>}, {transform_indices = @transform_1, window_bounds = array<i64: 8, 32>}, {transform_indices = @transform_2, window_bounds = array<i64: 8, 64>}]} {
    %c0 = arith.constant 0 : index
    %c0_0 = arith.constant 0 : index
    %0 = vector.load %arg3[%c0, %c0_0] : memref<8x32xf32, #tpu.memory_space<vmem>>, vector<8x32xf32>
    %c0_1 = arith.constant 0 : index
    %c0_2 = arith.constant 0 : index
    %1 = vector.load %arg2[%c0_1, %c0_2] : memref<8x64xf32, #tpu.memory_space<vmem>>, vector<8x32xf32>
    %2 = arith.addf %1, %0 : vector<8x32xf32>
    %c0_3 = arith.constant 0 : index
    %c0_4 = arith.constant 0 : index
    %3 = vector.load %arg4[%c0_3, %c0_4] : memref<8x64xf32, #tpu.memory_space<vmem>>, vector<8x32xf32>
    tpu.vector_store %arg4[%c0_3, %c0_4], %2 {strides = array<i32>} : memref<8x64xf32, #tpu.memory_space<vmem>>, vector<8x32xf32>,
    %c0_5 = arith.constant 0 : index
    %c32 = arith.constant 32 : index
    %4 = vector.load %arg2[%c0_5, %c32] : memref<8x64xf32, #tpu.memory_space<vmem>>, vector<8x32xf32>
    %5 = arith.addf %4, %0 : vector<8x32xf32>
    %c0_6 = arith.constant 0 : index
    %c32_7 = arith.constant 32 : index
    %6 = vector.load %arg4[%c0_6, %c32_7] : memref<8x64xf32, #tpu.memory_space<vmem>>, vector<8x32xf32>
    tpu.vector_store %arg4[%c0_6, %c32_7], %5 {strides = array<i32>} : memref<8x64xf32, #tpu.memory_space<vmem>>, vector<8x32xf32>,
    return
  }
  func.func @transform_0(%arg0: i32, %arg1: i32) -> (i32, i32) {
    %c0_i32 = arith.constant 0 : i32
    return %arg0, %arg1 : i32, i32
  }
  func.func @transform_1(%arg0: i32, %arg1: i32) -> (i32, i32) {
    %c0_i32 = arith.constant 0 : i32
    %c0_i32_0 = arith.constant 0 : i32
    return %arg0, %c0_i32 : i32, i32
  }
  func.func @transform_2(%arg0: i32, %arg1: i32) -> (i32, i32) {
    %c0_i32 = arith.constant 0 : i32
    return %arg0, %arg1 : i32, i32
  }
}

</mosaic_0001>

<bundles_post_ra>
// kernel: tpu_custom_call.1
= control target key start
LH: loop header
LB: loop body
LE: loop exit
PB: predicated region body
PF: predicated region fallthrough
CT: control target
= control target key end

     0   :  { %vm15_vm0 = vcmask 261120   ;;  %s100_s0 = inlined_call_operand.vmem [shape: f32[8,64], index: 0, kind: input, shape index: {}]   ;;  %s101_s1 = inlined_call_operand.vmem [shape: f32[500,32], index: 1, kind: input, shape index: {}]   ;;  %s102_s2 = inlined_call_operand.hbm [shape: f32[8,64], index: 2, kind: output, shape index: {}]  }
   0x1   :  { %v12_v0 = vld [vmem:[%s101_s1] sm:$0xff] }
   0x2   :  { %v13_v1 = vld [vmem:[%s100_s0] sm:$0xff] }
   0x3   :  { %7 = vsyncpa [#allocation3], 0  ;;  %v14_v2 = vadd.f32 %v13_v1, %v12_v0  ;;  %s65_s13 = smov 32   ;;  %s66_s14 = smov [#allocation2]   ;;  %vm23_vm1 = vcmask 523520  }
   0x4   :  { %19 = vrot.lane.b32.xlu0 %v12_v0, %s65_s13  ;;  %s31_s15 = sshll.u32 %s66_s14, 4  ;;  %s32_s15 = int_to_ptr.vmem [resolvable:$true] %s31_s15 }
   0x5   :  { %16 = vst.msk [vmem:[#allocation2] sm:$0xff] %vm15_vm0, %v14_v2  ;;  %s41_s16 = scalar_lea.vmem %s32_s15, 128  ;;  %p46_p1 = scmp.lt.s32.totalorder %s32_s15, %s32_s15 }
   0x6   :  { %p42_p0 = scmp.ne.s32.totalorder %s32_s15, %s41_s16  ;;  %p47_p2 = scmp.lt.s32.totalorder %s41_s16, %s41_s16 }
   0x8   :  { %p48_p3 = por %p47_p2, %p46_p1 }
   0xa   :  { %p49_p4 = pnand %p48_p3, %p42_p0 }
  0x76   :  { %v20_v3 = vpop.permute.xlu0 %19 }
  0x77   :  { %v22_v4 = vadd.f32 %v20_v3, %v13_v1 }
  0x79   :  { %24 = vst.msk [vmem:[#allocation2] sm:$0xff] %vm23_vm1, %v22_v4 }
  0x7a   :  { %52 = shalt.err (!%p49_p4)
}
  0x7b   :  { %s53_s17 = scalar_lea.hbm %s102_s2, 128 }
  0x7c   :  { %p54_p5 = scmp.ne.s32.totalorder %s102_s2, %s53_s17  ;;  %p57_p6 = scmp.lt.u32.totalorder %s53_s17, %s102_s2 }
  0x7e   :  { %p59_p7 = pnand %p57_p6, %p54_p5 }
  0x80   :  { %62 = shalt.err (!%p59_p7)
}
  0x81   :  { %34 = dma.vmem_to_hbm [thread:$0]  %s32_s15, 128, %s102_s2, [#allocation3]  }
  0x82   :  { %63 = dma.done.wait [#allocation3], 128  }
  0x83   :  { %64 = vsyncadd [#allocation3], 4294967168 }
  0x84   :  { %38 = vsyncpa [#allocation3], 1 }

</bundles_post_ra>
